<compile_context>
chip_gen: v7x
topology: tpu7x:2x2x1
jax: 0.10.0
libtpu: 0.0.40
codegen_flags: <defaults>
</compile_context>

<pallas_src>
import functools

import jax
import jax.numpy as jnp
from jax.experimental import pallas as pl
from jax.experimental.pallas import tpu as pltpu


def _round_up(x: int, m: int) -> int:
    return ((x + m - 1) // m) * m


def _koleo_rowmax_kernel(xq_ref, xk_ref, m_ref, *, eps, n_valid, n_padded,
                         block_q, block_k, matmul_dtype):
    """Online per-row max of the (off-diagonal) Gram matrix <xn_i, xn_j>."""
    i = pl.program_id(0)  # query-row tile ("parallel")
    j = pl.program_id(1)  # key-row tile ("arbitrary" reduction, output resident)

    @pl.when(j == 0)
    def _init():
        m_ref[...] = jnp.full(m_ref.shape, -jnp.inf, dtype=jnp.float32)

    # F.normalize(x, p=2, dim=-1, eps): x / max(||x||, eps) == x * rsqrt(max(||x||^2, eps^2)).
    q = xq_ref[...].astype(jnp.float32)
    k = xk_ref[...].astype(jnp.float32)
    qn = q * jax.lax.rsqrt(jnp.maximum(jnp.sum(q * q, axis=-1, keepdims=True), eps * eps))
    kn = k * jax.lax.rsqrt(jnp.maximum(jnp.sum(k * k, axis=-1, keepdims=True), eps * eps))

    # Gram block on the MXU: contract dim 1 of both operands (no transpose materialized).
    dots = jax.lax.dot_general(
        qn.astype(matmul_dtype), kn.astype(matmul_dtype),
        dimension_numbers=(((1,), (1,)), ((), ())),
        preferred_element_type=jnp.float32)

    # Diagonal -> -1 (torch: dots.view(-1)[::n+1].fill_(-1)); padded key columns -> -inf
    # so they can never be selected as nearest neighbors.
    gr = i * block_q + jax.lax.broadcasted_iota(jnp.int32, dots.shape, 0)
    gc = j * block_k + jax.lax.broadcasted_iota(jnp.int32, dots.shape, 1)
    dots = jnp.where(gr == gc, jnp.float32(-1.0), dots)
    if n_valid < n_padded:
        dots = jnp.where(gc >= n_valid, -jnp.inf, dots)

    # Running row-max (output block index depends only on i -> stays resident over j).
    m_ref[...] = jnp.maximum(m_ref[...], jnp.max(dots, axis=1, keepdims=True))


def koleo_loss(student_output: jax.Array, eps: float = 1e-6, *,
               block_size: int = 256,
               matmul_dtype=jnp.bfloat16) -> jax.Array:
    """Pallas TPU implementation of KoLeoLoss.forward. Returns an f32 scalar."""
    x = student_output
    if x.ndim != 2:
        raise ValueError(f"expected (B, D) student_output, got {x.shape}")
    b, d = x.shape
    eps = float(eps)

    # TODO(synk): the 2 - 2*maxdot identity assumes rows have norm >= eps (F.normalize
    # leaves near-zero rows non-unit) and drops torch's +1e-8 per-component pdist eps;
    # deviation is O(1e-7) for normal inputs.

    t = min(block_size, _round_up(b, 8))          # row tile, multiple of 8
    b_pad = _round_up(b, t)
    if b_pad != b:
        x = jnp.pad(x, ((0, b_pad - b), (0, 0)))  # zero rows, masked in-kernel

    kernel = functools.partial(
        _koleo_rowmax_kernel, eps=eps, n_valid=b, n_padded=b_pad,
        block_q=t, block_k=t, matmul_dtype=matmul_dtype)

    rowmax = pl.pallas_call(
        kernel,
        out_shape=jax.ShapeDtypeStruct((b_pad, 1), jnp.float32),
        grid_spec=pltpu.PrefetchScalarGridSpec(
            num_scalar_prefetch=0,
            grid=(b_pad // t, b_pad // t),
            in_specs=[pl.BlockSpec((t, d), lambda i, j: (i, 0)),   # query rows
                      pl.BlockSpec((t, d), lambda i, j: (j, 0))],  # key rows
            out_specs=pl.BlockSpec((t, 1), lambda i, j: (i, 0)),
        ),
        compiler_params=pltpu.CompilerParams(
            dimension_semantics=("parallel", "arbitrary")),
    )(x, x)

    # O(B) epilogue in plain JAX: dist^2 = 2 - 2*max_dot for unit-norm rows;
    # clamp(dist, eps) == clamp(dist^2, eps^2); -log(sqrt(s)) = -0.5*log(s).
    m = rowmax[:b, 0]
    d2 = jnp.maximum(2.0 - 2.0 * m, eps * eps)
    return -0.5 * jnp.mean(jnp.log(d2))


def _koleo_loss_ref(x: jax.Array, eps: float = 1e-6) -> jax.Array:
    """Pure-JAX reference, faithful to the PyTorch module."""
    x = x.astype(jnp.float32)
    xn = x / jnp.maximum(jnp.linalg.norm(x, axis=-1, keepdims=True), eps)
    dots = jnp.matmul(xn, xn.T, precision=jax.lax.Precision.HIGHEST)
    n = xn.shape[0]
    dots = dots.at[jnp.arange(n), jnp.arange(n)].set(-1.0)
    nn_idx = jnp.argmax(dots, axis=1)
    diff = xn - xn[nn_idx] + 1e-8
    dist = jnp.sqrt(jnp.sum(diff * diff, axis=-1))
    dist = jnp.maximum(dist, eps)
    return -jnp.mean(jnp.log(dist))


if __name__ == "__main__":
    # Small synthetic input consistent with the module: B x D backbone output.
    B, D = 8, 32
    key = jax.random.PRNGKey(0)
    student_output = jax.random.normal(key, (B, D), dtype=jnp.float32)

    ref = jax.block_until_ready(_koleo_loss_ref(student_output))

    # f32 MXU path: tight-ish check against the PyTorch-faithful reference.
    loss_f32 = jax.block_until_ready(koleo_loss(student_output, matmul_dtype=jnp.float32))
    assert loss_f32.shape == (), f"expected scalar loss, got {loss_f32.shape}"
    assert jnp.allclose(loss_f32, ref, atol=5e-3, rtol=5e-3), (loss_f32, ref)

    # Default bf16-MXU path (production regularizer precision): loose check.
    loss_bf16 = jax.block_until_ready(koleo_loss(student_output))
    assert jnp.allclose(loss_bf16, ref, atol=3e-2, rtol=3e-2), (loss_bf16, ref)

    # Non-multiple-of-8 batch: exercises row padding + padded-column masking.
    x2 = jax.random.normal(jax.random.PRNGKey(1), (13, D), dtype=jnp.float32)
    ref2 = jax.block_until_ready(_koleo_loss_ref(x2))
    loss2 = jax.block_until_ready(koleo_loss(x2, matmul_dtype=jnp.float32))
    assert jnp.allclose(loss2, ref2, atol=5e-3, rtol=5e-3), (loss2, ref2)

    # Multi-tile grid: exercises the online max across key tiles and pl.when init.
    x3 = jax.random.normal(jax.random.PRNGKey(2), (64, 128), dtype=jnp.float32)
    ref3 = jax.block_until_ready(_koleo_loss_ref(x3))
    loss3 = jax.block_until_ready(koleo_loss(x3, block_size=16, matmul_dtype=jnp.float32))
    assert jnp.allclose(loss3, ref3, atol=5e-3, rtol=5e-3), (loss3, ref3)

    print("KERNEL_OK")
</pallas_src>

<mosaic_0001>
module attributes {stable_mosaic.version = 11 : i64} {
  func.func @_koleo_rowmax_kernel(%arg0: i32, %arg1: i32, %arg2: memref<8x32xf32, #tpu.memory_space<vmem>>, %arg3: memref<8x32xf32, #tpu.memory_space<vmem>>, %arg4: memref<8x1xf32, #tpu.memory_space<vmem>>) attributes {dimension_semantics = [#tpu.dimension_semantics<parallel>, #tpu.dimension_semantics<arbitrary>], iteration_bounds = array<i64: 1, 1>, scalar_prefetch = 0 : i64, scratch_operands = 0 : i64, tpu.core_type = #tpu.core_type<tc>, window_params = [{transform_indices = @transform_0, window_bounds = array<i64: 8, 32>}, {transform_indices = @transform_1, window_bounds = array<i64: 8, 32>}, {transform_indices = @transform_2, window_bounds = array<i64: 8, 1>}]} {
    %c0_i32 = arith.constant 0 : i32
    %0 = arith.cmpi eq, %arg1, %c0_i32 : i32
    %1 = arith.extui %0 : i1 to i32
    %c0_i32_0 = arith.constant 0 : i32
    %2 = arith.cmpi ne, %1, %c0_i32_0 : i32
    scf.if %2 {
      %cst_15 = arith.constant 0xFF800000 : f32
      %38 = vector.broadcast %cst_15 : f32 to vector<8x1xf32>
      %c0_16 = arith.constant 0 : index
      %c0_17 = arith.constant 0 : index
      %39 = vector.load %arg4[%c0_16, %c0_17] : memref<8x1xf32, #tpu.memory_space<vmem>>, vector<8x1xf32>
      tpu.vector_store %arg4[%c0_16, %c0_17], %38 {strides = array<i32>} : memref<8x1xf32, #tpu.memory_space<vmem>>, vector<8x1xf32>,
    } else {
    }
    %c0 = arith.constant 0 : index
    %c0_1 = arith.constant 0 : index
    %3 = vector.load %arg2[%c0, %c0_1] : memref<8x32xf32, #tpu.memory_space<vmem>>, vector<8x32xf32>
    %c0_2 = arith.constant 0 : index
    %c0_3 = arith.constant 0 : index
    %4 = vector.load %arg3[%c0_2, %c0_3] : memref<8x32xf32, #tpu.memory_space<vmem>>, vector<8x32xf32>
    %5 = arith.mulf %3, %3 : vector<8x32xf32>
    %cst = arith.constant dense<0.000000e+00> : vector<8xf32>
    %6 = vector.multi_reduction <add>, %5, %cst [1] : vector<8x32xf32> to vector<8xf32>
    %7 = vector.shape_cast %6 : vector<8xf32> to vector<8x1xf32>
    %cst_4 = arith.constant 9.99999996E-13 : f32
    %8 = vector.broadcast %cst_4 : f32 to vector<8x1xf32>
    %9 = arith.maximumf %7, %8 : vector<8x1xf32>
    %10 = math.rsqrt %9 : vector<8x1xf32>
    %11 = vector.broadcast %10 : vector<8x1xf32> to vector<8x32xf32>
    %12 = arith.mulf %3, %11 : vector<8x32xf32>
    %13 = arith.mulf %4, %4 : vector<8x32xf32>
    %cst_5 = arith.constant dense<0.000000e+00> : vector<8xf32>
    %14 = vector.multi_reduction <add>, %13, %cst_5 [1] : vector<8x32xf32> to vector<8xf32>
    %15 = vector.shape_cast %14 : vector<8xf32> to vector<8x1xf32>
    %cst_6 = arith.constant 9.99999996E-13 : f32
    %16 = vector.broadcast %cst_6 : f32 to vector<8x1xf32>
    %17 = arith.maximumf %15, %16 : vector<8x1xf32>
    %18 = math.rsqrt %17 : vector<8x1xf32>
    %19 = vector.broadcast %18 : vector<8x1xf32> to vector<8x32xf32>
    %20 = arith.mulf %4, %19 : vector<8x32xf32>
    %cst_7 = arith.constant dense<0.000000e+00> : vector<8x8xf32>
    %21 = tpu.matmul %12, %20, %cst_7 {dimension_numbers = #tpu.dot_dimension_numbers<[1], [1], [0], [0], [0, 0, 1, 0], [], []>} : vector<8x32xf32>, vector<8x32xf32>, vector<8x8xf32> -> vector<8x8xf32>
    %c8_i32 = arith.constant 8 : i32
    %22 = arith.muli %arg0, %c8_i32 : i32
    %23 = tpu.iota {dimensions = array<i32: 0>} : vector<8x8xi32>
    %24 = vector.broadcast %22 : i32 to vector<8x8xi32>
    %25 = arith.addi %24, %23 : vector<8x8xi32>
    %c8_i32_8 = arith.constant 8 : i32
    %26 = arith.muli %arg1, %c8_i32_8 : i32
    %27 = tpu.iota {dimensions = array<i32: 1>} : vector<8x8xi32>
    %28 = vector.broadcast %26 : i32 to vector<8x8xi32>
    %29 = arith.addi %28, %27 : vector<8x8xi32>
    %30 = arith.cmpi eq, %25, %29 : vector<8x8xi32>
    %cst_9 = arith.constant -1.000000e+00 : f32
    %31 = vector.broadcast %cst_9 : f32 to vector<8x8xf32>
    %32 = arith.select %30, %31, %21 : vector<8x8xi1>, vector<8x8xf32>
    %c0_10 = arith.constant 0 : index
    %c0_11 = arith.constant 0 : index
    %33 = vector.load %arg4[%c0_10, %c0_11] : memref<8x1xf32, #tpu.memory_space<vmem>>, vector<8x1xf32>
    %cst_12 = arith.constant dense<0xFF800000> : vector<8xf32>
    %34 = vector.multi_reduction <maximumf>, %32, %cst_12 [1] : vector<8x8xf32> to vector<8xf32>
    %35 = vector.shape_cast %34 : vector<8xf32> to vector<8x1xf32>
    %36 = arith.maximumf %33, %35 : vector<8x1xf32>
    %c0_13 = arith.constant 0 : index
    %c0_14 = arith.constant 0 : index
    %37 = vector.load %arg4[%c0_13, %c0_14] : memref<8x1xf32, #tpu.memory_space<vmem>>, vector<8x1xf32>
    tpu.vector_store %arg4[%c0_13, %c0_14], %36 {strides = array<i32>} : memref<8x1xf32, #tpu.memory_space<vmem>>, vector<8x1xf32>,
    return
  }
  func.func @transform_0(%arg0: i32, %arg1: i32) -> (i32, i32) {
    %c0_i32 = arith.constant 0 : i32
    %c0_i32_0 = arith.constant 0 : i32
    return %arg0, %c0_i32 : i32, i32
  }
  func.func @transform_1(%arg0: i32, %arg1: i32) -> (i32, i32) {
    %c0_i32 = arith.constant 0 : i32
    %c0_i32_0 = arith.constant 0 : i32
    return %arg1, %c0_i32 : i32, i32
  }
  func.func @transform_2(%arg0: i32, %arg1: i32) -> (i32, i32) {
    %c0_i32 = arith.constant 0 : i32
    %c0_i32_0 = arith.constant 0 : i32
    return %arg0, %c0_i32 : i32, i32
  }
}

</mosaic_0001>

<bundles_post_ra>
// kernel: tpu_custom_call.1
= control target key start
LH: loop header
LB: loop body
LE: loop exit
PB: predicated region body
PF: predicated region fallthrough
CT: control target
= control target key end

     0   :  { %7 = vsyncpa [#allocation3], 0  ;;  %s285_s0 = inlined_call_operand.hbm [shape: f32[8,32], index: 0, kind: input, shape index: {}]   ;;  %s286_s1 = inlined_call_operand.hbm [shape: f32[8,32], index: 1, kind: input, shape index: {}]   ;;  %s287_s2 = inlined_call_operand.vmem [shape: f32[8,1], index: 2, kind: output, shape index: {}]  }
   0x1   :  { %8 = vsyncpa [#allocation5], 0  ;;  %s226_s9 = smov [#allocation2]   ;;  %s227_s11 = smov [#allocation4]  }
   0x2   :  { %s15_s10 = sshll.u32 %s226_s9, 4  ;;  %s25_s12 = sshll.u32 %s227_s11, 4  ;;  %s16_s10 = int_to_ptr.vmem [resolvable:$true] %s15_s10  ;;  %s26_s12 = int_to_ptr.vmem [resolvable:$true] %s25_s12 }
   0x3   :  { %s178_s15 = scalar_lea.hbm %s285_s0, 128 }
   0x4   :  { %p179_p0 = scmp.ne.s32.totalorder %s285_s0, %s178_s15  ;;  %p182_p1 = scmp.lt.u32.totalorder %s178_s15, %s285_s0 }
   0x6   :  { %p184_p2 = pnand %p182_p1, %p179_p0 }
   0x8   :  { %187 = shalt.err (!%p184_p2)
}
   0x9   :  { %s188_s20 = scalar_lea.vmem %s16_s10, 128  ;;  %p193_p4 = scmp.lt.s32.totalorder %s16_s10, %s16_s10 }
   0xa   :  { %p189_p3 = scmp.ne.s32.totalorder %s16_s10, %s188_s20  ;;  %p194_p5 = scmp.lt.s32.totalorder %s188_s20, %s188_s20 }
   0xc   :  { %p195_p6 = por %p194_p5, %p193_p4 }
   0xe   :  { %p196_p7 = pnand %p195_p6, %p189_p3 }
  0x10   :  { %199 = shalt.err (!%p196_p7)
}
  0x11   :  { %18 = dma.hbm_to_vmem [thread:$0]  %s285_s0, 128, %s16_s10, [#allocation3]  }
  0x12   :  { %s200_s25 = scalar_lea.hbm %s286_s1, 128 }
  0x13   :  { %p201_p8 = scmp.ne.s32.totalorder %s286_s1, %s200_s25  ;;  %p204_p9 = scmp.lt.u32.totalorder %s200_s25, %s286_s1 }
  0x15   :  { %p206_p10 = pnand %p204_p9, %p201_p8 }
  0x17   :  { %209 = shalt.err (!%p206_p10)
}
  0x18   :  { %s210_s30 = scalar_lea.vmem %s26_s12, 128  ;;  %p215_p12 = scmp.lt.s32.totalorder %s26_s12, %s26_s12 }
  0x19   :  { %p211_p11 = scmp.ne.s32.totalorder %s26_s12, %s210_s30  ;;  %p216_p13 = scmp.lt.s32.totalorder %s210_s30, %s210_s30 }
  0x1b   :  { %p217_p0 = por %p216_p13, %p215_p12 }
  0x1d   :  { %p218_p1 = pnand %p217_p0, %p211_p11 }
  0x1f   :  { %221 = shalt.err (!%p218_p1)
}
  0x20   :  { %28 = dma.hbm_to_vmem [thread:$0]  %s286_s1, 128, %s26_s12, [#allocation5]  }
  0x21   :  { %222 = dma.done.wait [#allocation3], 128  }
  0x22   :  { %223 = vsyncadd [#allocation3], 4294967168 }
  0x23   :  { %224 = dma.done.wait [#allocation5], 128  }
  0x24   :  { %225 = vsyncadd [#allocation5], 4294967168  ;;  %vm39_vm0 = vcmask 7168   ;;  %v228_v0 = vmov -inf   ;;  %v42_v1 = vld [vmem:[#allocation4] sm:$0xff]  ;;  %vm44_vm1 = vcmask 261120   ;;  %v135_v16 = vlaneseq }
  0x25   :  { %40 = vst.msk [vmem:[%s287_s2] sm:$0xff] %vm39_vm0, %v228_v0  ;;  %v41_v2 = vld [vmem:[#allocation2] sm:$0xff]  ;;  %v51_v3 = vmul.f32 %v42_v1, %v42_v1  ;;  %v229_v7 = vmov 0.0   ;;  %vm230_vm2 = vmmov 0   ;;  %vm147_vm4 = vcmask 64512  }
  0x26   :  { %v43_v4 = vmul.f32 %v41_v2, %v41_v2  ;;  %164 = vmatprep.subr.mxu0 %v229_v7  ;;  %166 = vmatprep.mubr.msk.f32.mxu0 %vm230_vm2, %v229_v7  ;;  %v136_v17 = vshrl.u32 %v135_v16, 7  ;;  %v141_v18 = vand.u32 127, %v135_v16 }
  0x27   :  { %v52_v5 = vsel %vm44_vm1, %v51_v3, 0.0 }
  0x28   :  { %53 = vadd.xlane.f32.xlu0 %v52_v5  ;;  %v45_v6 = vsel %vm44_vm1, %v43_v4, 0.0  ;;  %vm144_vm3 = vcmp.eq.s32.totalorder %v136_v17, %v141_v18 }
  0x2c   :  { %46 = vadd.xlane.f32.xlu0 %v45_v6  ;;  %v146_v23 = vld [vmem:[%s287_s2] sm:$0xff] }
  0xb5   :  { %v54_v8 = vpop.xlane.xlu0 %53 }
  0xb6   :  { %v55_v9 = vmax.f32 %v54_v8, 1e-12 }
  0xb8   :  { %174 = vrsqrt.f32 %v55_v9 }
  0xb9   :  { %v47_v10 = vpop.xlane.xlu0 %46 }
  0xba   :  { %v48_v11 = vmax.f32 %v47_v10, 1e-12 }
  0xbc   :  { %176 = vrsqrt.f32 %v48_v11 }
  0xc2   :  { %v175_v12 = vpop.eup %174 }
  0xc3   :  { %v57_v13 = vmul.f32 %v175_v12, %v42_v1 }
  0xc5   :  { %165 = vmatpush3.xpose.msk.msra.mxu0 %vm44_vm1, %v57_v13 }
  0xc6   :  { %v177_v14 = vpop.eup %176 }
  0xc7   :  { %v50_v15 = vmul.f32 %v177_v14, %v41_v2 }
  0xc9   :  { %167 = vmatmul.mubr.msk.f32.vlgmr.msra.gmra.mrb[0].mxu0 %vm44_vm1, %v50_v15 }
 0x19c   :  { %v130_v19 = vpop.f32.mrb[0].mxu0 }
 0x19d   :  { %v145_v20 = vsel %vm144_vm3, -1.0, %v130_v19  ;;  %v168_v21 = vpop.f32.mrb[1].mxu0 }
 0x19e   :  { %v148_v22 = vsel %vm147_vm4, %v145_v20, -inf }
 0x19f   :  { %149 = vmax.xlane.f32.xlu1 %v148_v22 }
 0x22c   :  { %v150_v24 = vpop.xlane.xlu1 %149 }
 0x22d   :  { %v151_v25 = vmax.f32 %v146_v23, %v150_v24 }
 0x22f   :  { %153 = vst.msk [vmem:[%s287_s2] sm:$0xff] %vm39_vm0, %v151_v25 }
 0x230   :  { %158 = vsyncpa [#allocation3], 1 }
 0x231   :  { %159 = vsyncpa [#allocation5], 1 }

</bundles_post_ra>
